<compile_context>
chip_gen: v6e
topology: v6e:2x2x1
jax: 0.10.0
libtpu: 0.0.40
codegen_flags: <defaults>
</compile_context>

<pallas_src>
import math

import jax
import jax.numpy as jnp
from jax import lax
from jax.experimental import pallas as pl
from jax.experimental.pallas import tpu as pltpu

_ALPHA = 0.0001
_K = 2.0


def lrn_kernel(mask_ref, x_ref, o_ref):
    # mask_ref: (4, GC, 1) f32, rows pre-scaled by alpha (0 or alpha).
    # x_ref / o_ref: (1, GC, T_HW).
    xs = x_ref[0]                                     # (GC, T_HW)
    gc = xs.shape[0]
    xf = xs.astype(jnp.float32)
    x_sq = xf * xf
    m = mask_ref[...]                                 # (4, GC, 1)
    # 5-wide zero-padded channel window via sublane rotations (XLU) and
    # alpha-scaled boundary masks (VPU); exact in f32, MXU stays idle.
    d = _K + _ALPHA * x_sq
    d = d + m[0] * pltpu.roll(x_sq, 1, axis=0)        # x_sq[c-1]
    d = d + m[1] * pltpu.roll(x_sq, 2, axis=0)        # x_sq[c-2]
    d = d + m[2] * pltpu.roll(x_sq, gc - 1, axis=0)   # x_sq[c+1]
    d = d + m[3] * pltpu.roll(x_sq, gc - 2, axis=0)   # x_sq[c+2]
    t = lax.rsqrt(d)                                  # d^-0.5   (EUP)
    # x * d^-0.75 = x * rsqrt(d) * sqrt(rsqrt(d))
    o_ref[0] = (xf * (t * jnp.sqrt(t))).astype(o_ref.dtype)


def _vmem_capacity_bytes():
    try:
        return int(pltpu.get_tpu_info().vmem_capacity_bytes)
    except Exception:
        return 64 << 20   # conservative (v7x-sized) fallback


def lrn(x):
    """x: (N, C, H, W) -> LRN(x), same shape/dtype."""
    N, C, H, W = x.shape
    HW = H * W
    itemsize = jnp.dtype(x.dtype).itemsize

    vmem_cap = _vmem_capacity_bytes()
    # ~4 MiB per pipeline buffer on 128 MiB-VMEM chips (v5e/v6e), ~2 MiB on v7x.
    buf_budget = (4 << 20) if vmem_cap > (64 << 20) else (2 << 20)

    # Fold batches onto the sublane axis so GC = lcm(C, 8) (full vregs for
    # small / awkward C).  Skip folding if it would blow the block budget.
    G = 8 // math.gcd(C, 8)
    if G > 1 and G * C * 128 * itemsize > buf_budget:
        G = 1
    GC = G * C
    NG = pl.cdiv(N, G)

    # Lane-dense HW tiling, no HW padding: either one full-width block or a
    # multiple-of-128 tile (last block partial -> masked by Pallas).
    lanes = max(128, (buf_budget // (GC * itemsize)) // 128 * 128)
    T_HW = HW if HW <= lanes else lanes

    # Megacore balance (v7x: 2 TCs share the "parallel" grid axes): prefer an
    # even number of tiles >= 2 when splitting is cheap.
    for _ in range(4):
        total = NG * pl.cdiv(HW, T_HW)
        if total >= 2 and total % 2 == 0:
            break
        cand = max(128, (T_HW // 2) // 128 * 128)
        if cand >= T_HW:
            break
        T_HW = cand
    n_hw_tiles = pl.cdiv(HW, T_HW)

    # Only pad the batch axis, and only when folding requires it.
    xf = x.reshape(N, C, HW)
    N_pad = NG * G
    if N_pad != N:
        xf = jnp.pad(xf, ((0, N_pad - N), (0, 0), (0, 0)))
    xf = xf.reshape(NG, GC, HW)

    # Boundary masks, pre-scaled by alpha: row c only adds neighbor c+off when
    # it stays inside the same image's channel range (zero-padded window).
    cm = jnp.arange(GC, dtype=jnp.int32) % C
    a = jnp.float32(_ALPHA)
    z = jnp.float32(0.0)
    masks = jnp.stack([
        jnp.where(cm >= 1, a, z),        # pairs with roll(+1)   : x_sq[c-1]
        jnp.where(cm >= 2, a, z),        # pairs with roll(+2)   : x_sq[c-2]
        jnp.where(cm <= C - 2, a, z),    # pairs with roll(GC-1) : x_sq[c+1]
        jnp.where(cm <= C - 3, a, z),    # pairs with roll(GC-2) : x_sq[c+2]
    ])[..., None]                        # (4, GC, 1) float32

    block_bytes = GC * T_HW * itemsize
    vmem_limit = int(min(vmem_cap // 2, max(32 << 20, 6 * block_bytes)))

    out = pl.pallas_call(
        lrn_kernel,
        out_shape=jax.ShapeDtypeStruct((NG, GC, HW), x.dtype),
        grid_spec=pl.GridSpec(
            grid=(NG, n_hw_tiles),
            in_specs=[
                pl.BlockSpec((4, GC, 1), lambda n, t: (0, 0, 0)),
                pl.BlockSpec((1, GC, T_HW), lambda n, t: (n, 0, t)),
            ],
            out_specs=pl.BlockSpec((1, GC, T_HW), lambda n, t: (n, 0, t)),
        ),
        compiler_params=pltpu.CompilerParams(
            dimension_semantics=("parallel", "parallel"),
            vmem_limit_bytes=vmem_limit,
        ),
    )(masks, xf)

    out = out.reshape(N_pad, C, HW)
    if N_pad != N:
        out = out[:N]
    return out.reshape(N, C, H, W)


def lrn_ref(x):
    # Pure-JAX reference mirroring the PyTorch forward (alpha = 0.0001, NOT
    # alpha / size; k = 2.0; beta = 0.75; zero-padded 5-wide channel window).
    x_sq = x ** 2
    N, C, H, W = x.shape
    ext = jnp.pad(x_sq, ((0, 0), (2, 2), (0, 0), (0, 0)))
    sumsq = sum(ext[:, i:i + C] for i in range(5))
    return x / (2.0 + 0.0001 * sumsq) ** 0.75


if __name__ == "__main__":
    key = jax.random.PRNGKey(0)
    x = jax.random.normal(key, (2, 4, 16, 16), dtype=jnp.float32)

    out = jax.block_until_ready(lrn(x))

    ref = lrn_ref(x)
    assert out.shape == x.shape and out.dtype == x.dtype
    assert jnp.allclose(out, ref, atol=1e-5, rtol=1e-5)
    print("KERNEL_OK")
</pallas_src>

<mosaic_0001>
module attributes {stable_mosaic.version = 11 : i64} {
  func.func @lrn_kernel(%arg0: i32, %arg1: i32, %arg2: memref<4x8x1xf32, #tpu.memory_space<vmem>>, %arg3: memref<1x8x128xf32, #tpu.memory_space<vmem>>, %arg4: memref<1x8x128xf32, #tpu.memory_space<vmem>>) attributes {dimension_semantics = [#tpu.dimension_semantics<parallel>, #tpu.dimension_semantics<parallel>], iteration_bounds = array<i64: 1, 2>, scalar_prefetch = 0 : i64, scratch_operands = 0 : i64, tpu.core_type = #tpu.core_type<tc>, window_params = [{pipeline_mode = #tpu.pipeline_mode<synchronous>, transform_indices = @transform_0, window_bounds = array<i64: 4, 8, 1>}, {transform_indices = @transform_1, window_bounds = array<i64: 1, 8, 128>}, {transform_indices = @transform_2, window_bounds = array<i64: 1, 8, 128>}]} {
    %c0 = arith.constant 0 : index
    %c0_0 = arith.constant 0 : index
    %c0_1 = arith.constant 0 : index
    %0 = vector.load %arg3[%c0, %c0_0, %c0_1] : memref<1x8x128xf32, #tpu.memory_space<vmem>>, vector<1x8x128xf32>
    %1 = vector.shape_cast %0 : vector<1x8x128xf32> to vector<8x128xf32>
    %2 = arith.mulf %1, %1 : vector<8x128xf32>
    %c0_2 = arith.constant 0 : index
    %c0_3 = arith.constant 0 : index
    %c0_4 = arith.constant 0 : index
    %3 = vector.load %arg2[%c0_2, %c0_3, %c0_4] : memref<4x8x1xf32, #tpu.memory_space<vmem>>, vector<4x8x1xf32>
    %cst = arith.constant 9.99999974E-5 : f32
    %4 = vector.broadcast %cst : f32 to vector<8x128xf32>
    %5 = arith.mulf %4, %2 : vector<8x128xf32>
    %cst_5 = arith.constant 2.000000e+00 : f32
    %6 = vector.broadcast %cst_5 : f32 to vector<8x128xf32>
    %7 = arith.addf %6, %5 : vector<8x128xf32>
    %8 = vector.extract_strided_slice %3 {offsets = [0, 0, 0], sizes = [1, 8, 1], strides = [1, 1, 1]} : vector<4x8x1xf32> to vector<1x8x1xf32>
    %9 = vector.shape_cast %8 : vector<1x8x1xf32> to vector<8x1xf32>
    %c1_i32 = arith.constant 1 : i32
    %10 = tpu.dynamic_rotate %2 by %c1_i32 dim 0 : vector<8x128xf32>, i32 -> vector<8x128xf32>
    %11 = vector.broadcast %9 : vector<8x1xf32> to vector<8x128xf32>
    %12 = arith.mulf %11, %10 : vector<8x128xf32>
    %13 = arith.addf %7, %12 : vector<8x128xf32>
    %14 = vector.extract_strided_slice %3 {offsets = [1, 0, 0], sizes = [1, 8, 1], strides = [1, 1, 1]} : vector<4x8x1xf32> to vector<1x8x1xf32>
    %15 = vector.shape_cast %14 : vector<1x8x1xf32> to vector<8x1xf32>
    %c2_i32 = arith.constant 2 : i32
    %16 = tpu.dynamic_rotate %2 by %c2_i32 dim 0 : vector<8x128xf32>, i32 -> vector<8x128xf32>
    %17 = vector.broadcast %15 : vector<8x1xf32> to vector<8x128xf32>
    %18 = arith.mulf %17, %16 : vector<8x128xf32>
    %19 = arith.addf %13, %18 : vector<8x128xf32>
    %20 = vector.extract_strided_slice %3 {offsets = [2, 0, 0], sizes = [1, 8, 1], strides = [1, 1, 1]} : vector<4x8x1xf32> to vector<1x8x1xf32>
    %21 = vector.shape_cast %20 : vector<1x8x1xf32> to vector<8x1xf32>
    %c7_i32 = arith.constant 7 : i32
    %22 = tpu.dynamic_rotate %2 by %c7_i32 dim 0 : vector<8x128xf32>, i32 -> vector<8x128xf32>
    %23 = vector.broadcast %21 : vector<8x1xf32> to vector<8x128xf32>
    %24 = arith.mulf %23, %22 : vector<8x128xf32>
    %25 = arith.addf %19, %24 : vector<8x128xf32>
    %26 = vector.extract_strided_slice %3 {offsets = [3, 0, 0], sizes = [1, 8, 1], strides = [1, 1, 1]} : vector<4x8x1xf32> to vector<1x8x1xf32>
    %27 = vector.shape_cast %26 : vector<1x8x1xf32> to vector<8x1xf32>
    %c6_i32 = arith.constant 6 : i32
    %28 = tpu.dynamic_rotate %2 by %c6_i32 dim 0 : vector<8x128xf32>, i32 -> vector<8x128xf32>
    %29 = vector.broadcast %27 : vector<8x1xf32> to vector<8x128xf32>
    %30 = arith.mulf %29, %28 : vector<8x128xf32>
    %31 = arith.addf %25, %30 : vector<8x128xf32>
    %32 = math.rsqrt %31 : vector<8x128xf32>
    %33 = math.sqrt %32 : vector<8x128xf32>
    %34 = arith.mulf %32, %33 : vector<8x128xf32>
    %35 = arith.mulf %1, %34 : vector<8x128xf32>
    %c0_6 = arith.constant 0 : index
    %c0_7 = arith.constant 0 : index
    %c0_8 = arith.constant 0 : index
    %36 = vector.load %arg4[%c0_6, %c0_7, %c0_8] : memref<1x8x128xf32, #tpu.memory_space<vmem>>, vector<1x8x128xf32>
    %37 = vector.shape_cast %36 : vector<1x8x128xf32> to vector<8x128xf32>
    %38 = vector.shape_cast %35 : vector<8x128xf32> to vector<1x8x128xf32>
    tpu.vector_store %arg4[%c0_6, %c0_7, %c0_8], %38 {strides = array<i32>} : memref<1x8x128xf32, #tpu.memory_space<vmem>>, vector<1x8x128xf32>,
    return
  }
  func.func @transform_0(%arg0: i32, %arg1: i32) -> (i32, i32, i32) {
    %c0_i32 = arith.constant 0 : i32
    %c0_i32_0 = arith.constant 0 : i32
    %c0_i32_1 = arith.constant 0 : i32
    %c0_i32_2 = arith.constant 0 : i32
    return %c0_i32, %c0_i32_0, %c0_i32_1 : i32, i32, i32
  }
  func.func @transform_1(%arg0: i32, %arg1: i32) -> (i32, i32, i32) {
    %c0_i32 = arith.constant 0 : i32
    %c0_i32_0 = arith.constant 0 : i32
    return %arg0, %c0_i32, %arg1 : i32, i32, i32
  }
  func.func @transform_2(%arg0: i32, %arg1: i32) -> (i32, i32, i32) {
    %c0_i32 = arith.constant 0 : i32
    %c0_i32_0 = arith.constant 0 : i32
    return %arg0, %c0_i32, %arg1 : i32, i32, i32
  }
}

</mosaic_0001>

<bundles_post_ra>
// kernel: tpu_custom_call.1
= control target key start
LH: loop header
LB: loop body
LE: loop exit
PB: predicated region body
PF: predicated region fallthrough
CT: control target
= control target key end

     0   :  { %7 = vsyncpa [#allocation3], 0  ;;  %s588_s0 = inlined_call_operand.vmem [shape: f32[4,8,1], index: 0, kind: input, shape index: {}]   ;;  %s589_s1 = inlined_call_operand.vmem [shape: f32[1,8,256], index: 1, kind: input, shape index: {}]   ;;  %s590_s2 = inlined_call_operand.hbm [shape: f32[1,8,256], index: 2, kind: output, shape index: {}]  }
   0x1   :  { %9 = vsyncpa [#allocation3 + $0x1], 0  ;;  %s477_s9 = smov 0   ;;  %s479_s10 = smov 0  }
   0x2   :  { %s481_s11 = smov 0   ;;  %s483_s12 = smov 0  }
   0x3   :  { %s485_s13 = smov 0   ;;  %s487_s14 = smov 0  }
   0x4 LB: > { %s309_s15 = sadd.s32 4294967295, %s458_s14   ;;  %s310_s16 = sadd.s32 4294967294, %s458_s14   ;;  %s458_s14 = sphi %s487_s14, %s15_s14   ;;  %s454_s13 = sphi %s485_s13, %s597_s13   ;;  %s450_s12 = sphi %s483_s12, %s596_s12   ;;  %s446_s11 = sphi %s481_s11, %s595_s11   ;;  %s442_s10 = sphi %s479_s10, %s594_s10   ;;  %s438_s9 = sphi %s477_s9, %s593_s9  }
   0x5   : > { %s24_s17 = sadd.s32 1, %s454_s13  ;;  %s85_s18 = sadd.s32 1, %s446_s11 }
   0x6   : > { %p25_p0 = scmp.ge.s32.totalorder %s24_s17, 2  ;;  %p95_p1 = scmp.ne.s32.totalorder %s446_s11, %s442_s10 }
   0x7   : > { %p96_p2 = scmp.eq.s32.totalorder %s309_s15, 1  ;;  %p101_p3 = scmp.ne.s32.totalorder %s442_s10, %s438_s9 }
   0x8   : > { %s599_s17 = smov (%p25_p0, %s24_s17), 0  ;;  %p102_p5 = scmp.eq.s32.totalorder %s310_s16, 1 }
   0x9   : > { %p517_p4 = por %p96_p2, %p95_p1  ;;  %s81_s20 = ssub.s32 %s454_s13, %s599_s17 }
   0xa   : > { %p313_p6 = scmp.ge.s32.totalorder %s458_s14, 1  ;;  %p83_p7 = scmp.eq.s32.totalorder %s81_s20, 0 }
   0xb   : > { %p524_p8 = por %p102_p5, %p101_p3  ;;  %p134_p9 = scmp.lt.s32.totalorder %s458_s14, 3 }
   0xc   : > { %s530_s22 = scalar_select %p83_p7, %s446_s11, %s85_s18  }
   0xd   : > { %p135_p10 = pnand %p313_p6, %p134_p9 }
   0xe   : > { %p161_p11 = scmp.lt.s32.totalorder (!%p135_p10), %s450_s12, 1  ;;  %s156_s8 = sand.u32 (!%p135_p10), 1, %s442_s10  }
   0xf   : > { %138 = sbr.rel (%p135_p10) target bundleno = 207 (0xcf), region = 28  ;;  %s314_s15 = sshll.u32 (!%p135_p10), %s156_s8, 3 }
  0x10   : > { %s317_s16 = sshll.u32 (!%p135_p10), %s450_s12, 7  ;;  %s158_s18 = scalar_lea.vmem (!%p135_p10), [#allocation2], %s314_s15 }
  0x11   : > { %s234_s20 = sshll.u32 (!%p135_p10), %s158_s18, 4  ;;  %s232_s25 = scalar_lea.hbm (!%p135_p10), %s590_s2, %s317_s16  ;;  %s235_s20 = int_to_ptr.vmem [resolvable:$true] %s234_s20 }
  0x12   : > { %s219_s26 = scalar_lea.sflag (!%p135_p10), [#allocation3], %s156_s8  ;;  %s382_s27 = scalar_lea.vmem (!%p135_p10), %s235_s20, 128 }
  0x13   : > { %p383_p12 = scmp.ne.s32.totalorder (!%p135_p10), %s235_s20, %s382_s27  ;;  %s461_s28 = smov (!%p135_p10), [#allocation2]  }
  0x14   : > { %v171_v0 = vld [vmem:[%s588_s0 + $0x10] sm:$0xff]  ;;  %v169_v1 = vld [vmem:[%s588_s0] sm:$0xff]  ;;  %v460_v2 = vmov 0   ;;  %v172_v3 = vld [vmem:[%s588_s0 + $0x18] sm:$0xff]  ;;  %s162_s3 = scalar_select %p161_p11, %s450_s12, 1 }
  0x15   : > { %377 = vset.pattern.permute.xlu1 %v460_v2  ;;  %376 = vset.pattern.permute.xlu0 %v460_v2  ;;  %v170_v4 = vld [vmem:[%s588_s0 + $0x8] sm:$0xff]  ;;  %p384_p13 = pnand %p383_p12, %p517_p4  ;;  %s386_s29 = sshll.u32 %s461_s28, 4  ;;  %s387_s29 = int_to_ptr.vmem [resolvable:$false] %s386_s29 }
  0x16   : > { %194 = vperm.xlu1 %377, %v171_v0   ;;  %178 = vperm.xlu0 %376, %v169_v1   ;;  %s315_s4 = sshll.u32 %s162_s3, 3  ;;  %s388_s12 = scalar_lea.vmem %s387_s29, 256 }
  0x17   : > { %s166_s7 = scalar_lea.vmem %s589_s1, %s315_s4  ;;  %p385_p0 = pneg %p384_p13 }
  0x18   : > { %v167_v5 = vld [vmem:[%s166_s7] sm:$0xff]  ;;  %p389_p1 = scmp.lt.s32.totalorder %s235_s20, %s387_s29  ;;  %p390_p2 = scmp.lt.s32.totalorder %s388_s12, %s382_s27 }
  0x19   : > { %v168_v6 = vmul.f32 %v167_v5, %v167_v5 }
  0x1a   : > { %202 = vperm.xlu1 %377, %v172_v3   ;;  %186 = vperm.xlu0 %376, %v170_v4   ;;  %p391_p3 = por %p390_p2, %p389_p1 }
  0x1b   : > { %v173_v7 = vmul.f32 0.0001, %v168_v6  ;;  %v175_v8 = vrot.slane %v168_v6, 7  ;;  %v183_v13 = vrot.slane %v168_v6, 6  ;;  %v191_v14 = vrot.slane %v168_v6, 1 }
  0x1c   : > { %v199_v17 = vrot.slane %v168_v6, 2  ;;  %p392_p5 = pnand %p391_p3, %p385_p0 }
  0x1d   : > { %v174_v11 = vadd.f32 2.0, %v173_v7 }
  0x91   : > { %v195_v9 = vpop.permute.xlu1 %194  ;;  %v179_v10 = vpop.permute.xlu0 %178 }
  0x92   : > { %v181_v12 = vmul.f32 %v179_v10, %v175_v8  ;;  %v197_v20 = vmul.f32 %v195_v9, %v191_v14 }
  0x94   : > { %v182_v16 = vadd.f32 %v181_v12, %v174_v11 }
  0x95   : > { %v187_v15 = vpop.permute.xlu0 %186  ;;  %v203_v19 = vpop.permute.xlu1 %202 }
  0x96   : > { %v189_v18 = vmul.f32 %v187_v15, %v183_v13  ;;  %v205_v22 = vmul.f32 %v203_v19, %v199_v17 }
  0x98   : > { %v190_v21 = vadd.f32 %v189_v18, %v182_v16 }
  0x9a   : > { %v198_v23 = vadd.f32 %v197_v20, %v190_v21 }
  0x9c   : > { %v206_v24 = vadd.f32 %v205_v22, %v198_v23 }
  0x9e   : > { %378 = vrsqrt.f32 %v206_v24 }
  0xab   : > { %v379_v25 = vpop.eup %378 }
  0xac   : > { %380 = vrsqrt.f32 %v379_v25  ;;  %vm210_vm0 = vcmp.eq.f32.partialorder %v379_v25, inf  ;;  %v213_v28 = vand.u32 2147483648, %v379_v25  ;;  %vm212_vm1 = vcmp.eq.f32.partialorder %v379_v25, 0.0 }
  0xb9   : > { %v381_v26 = vpop.eup %380 }
  0xba   : > { %v209_v27 = vmul.f32 %v381_v26, %v379_v25 }
  0xbc   : > { %v211_v29 = vsel %vm210_vm0, %v379_v25, %v209_v27 }
  0xbd   : > { %v214_v30 = vsel %vm212_vm1, %v213_v28, %v211_v29 }
  0xbe   : > { %v215_v31 = vmul.f32 %v379_v25, %v214_v30 }
  0xc0   : > { %v216_v32 = vmul.f32 %v215_v31, %v167_v5 }
  0xc2   : > { %217 = vst [vmem:[%s158_s18] sm:$0xff] %v216_v32 }
  0xc3   : > { %395 = shalt.err (!%p392_p5)
}
  0xc4   : > { %s396_s30 = scalar_lea.hbm %s232_s25, 128  ;;  %s400_s5 = scalar_lea.hbm %s590_s2, 256 }
  0xc5   : > { %p397_p6 = scmp.ne.s32.totalorder %s232_s25, %s396_s30  ;;  %p401_p10 = scmp.lt.s32.totalorder %s232_s25, %s590_s2 }
  0xc6   : > { %p402_p11 = scmp.lt.s32.totalorder %s400_s5, %s396_s30 }
  0xc7   : > { %p398_p7 = pnand %p397_p6, %p517_p4 }
  0xc8   : > { %p403_p12 = por %p402_p11, %p401_p10 }
  0xc9   : > { %p399_p9 = pneg %p398_p7 }
  0xcb   : > { %p404_p13 = pnand %p403_p12, %p399_p9 }
  0xcd   : > { %407 = shalt.err (!%p404_p13)
}
  0xce   : > { %320 = dma.vmem_to_hbm [thread:$0]  (%p517_p4), %s235_s20, 128, %s232_s25, %s219_s26  }
  0xcf PF: > { %p326_p0 = scmp.ge.s32.totalorder %s458_s14, 2  ;;  %s246_s8 = sand.u32 1, %s438_s9  }
  0xd0   : > { %s247_s15 = scalar_lea.sflag [#allocation3], %s246_s8 }
  0xd1   : > { %p323_p1 = pnand %p326_p0, %p524_p8 }
  0xd3   : > { %p324_p2 = pneg %p323_p1 }
  0xd5   : > { %433 = dma.done.wait (%p324_p2), %s247_s15, 128  }
  0xd6   : > { %435 = vsyncadd (%p324_p2), %s247_s15, 4294967168  ;;  %s15_s14 = sadd.s32 1, %s458_s14   ;;  %s593_s9 = smov %s442_s10 }
  0xd7   : > { %p12_p3 = scmp.ge.s32.totalorder %s15_s14, 4   ;;  %s594_s10 = smov %s446_s11 }
  0xd8   : > { %s595_s11 = smov %s530_s22  ;;  %s596_s12 = smov %s454_s13 }
  0xd9   : > { %s597_s13 = smov %s599_s17  ;;  %14 = sbr.rel (!%p12_p3) target bundleno = 4 (0x4), region = 63 }
  0xde   :  { %252 = vsyncpa [#allocation3], 1 }
  0xdf   :  { %254 = vsyncpa [#allocation3 + $0x1], 1 }

</bundles_post_ra>
